<compile_context>
chip_gen: v6e
topology: v6e:2x2x1
jax: 0.10.0
libtpu: 0.0.40
codegen_flags: <defaults>
</compile_context>

<pallas_src>
import functools

import jax
import jax.numpy as jnp
from jax.experimental import pallas as pl
from jax.experimental.pallas import tpu as pltpu

_LANE = 128
_SUBLANE = 8
_H1 = 128   # fc1 output width (fixed by the module)
_H2 = 64    # fc2 output width (fixed by the module)


def _round_up(x, m):
    return ((x + m - 1) // m) * m


def _cdiv(a, b):
    return -(-a // b)


def _mlp_kernel(x_ref, w1_ref, b1_ref, w2_ref, b2_ref, w3_ref, b3_ref, o_ref,
                *, w_softmax: bool):
    # x is DMA'd as f32 and cast to bf16 in-kernel (cheap VPU op, hidden under
    # the writeback-bound pipeline).  MXU matmuls accumulate in f32.
    x = x_ref[...].astype(jnp.bfloat16)
    # fc1 + tanh
    h1 = jnp.tanh(
        jnp.dot(x, w1_ref[...], preferred_element_type=jnp.float32) + b1_ref[...])
    # fc2 (padded to 128 lanes) + tanh ; padded lanes are tanh(0)=0
    h2 = jnp.tanh(
        jnp.dot(h1.astype(jnp.bfloat16), w2_ref[...],
                preferred_element_type=jnp.float32) + b2_ref[...])
    # fc3 -> lane-dense (TM, n_out_padded) logits
    logits = (jnp.dot(h2.astype(jnp.bfloat16), w3_ref[...],
                      preferred_element_type=jnp.float32) + b3_ref[...])
    if w_softmax:
        # Padded logit lanes are already ~-1e30 (baked into b3) -> exp = 0, so
        # they cannot corrupt the denominator.  Exact division keeps row sums
        # at 1.0 to f32 precision.
        m = jnp.max(logits, axis=-1, keepdims=True)
        e = jnp.exp(logits - m)
        out = e / jnp.sum(e, axis=-1, keepdims=True)
    else:
        out = logits
    o_ref[...] = out.astype(o_ref.dtype)


def softmax_model_forward(x, params, w_softmax: str = "yes", tm: int = 1024,
                          out_dtype=jnp.float32, return_padded: bool = False):
    """Pallas forward pass of SoftmaxModel.

    x:      (batch, n_in) float32
    params: w1 (n_in,128), b1 (1,128), w2 (128,64), b2 (1,64),
            w3 (64,n_out), b3 (1,n_out)
    out_dtype: jnp.float32 (default; matches PyTorch) or jnp.bfloat16 (halves
               the dominant HBM writeback if the consumer tolerates bf16).
    return_padded: return the (padded_batch, n_out_padded) slab and skip the
               extra HBM pass of the narrowing slice.
    """
    batch, n_in = x.shape
    n_out = params["w3"].shape[1]
    n_out_p = _round_up(max(n_out, _LANE), _LANE)     # lane-dense output width
    h2_p = _round_up(_H2, _LANE)                      # fc2 padded to 128 lanes

    # Balanced batch tiling: minimize padded rows for awkward batch sizes.
    tm = max(_SUBLANE, min(tm, _round_up(batch, _SUBLANE)))
    n_blocks = _cdiv(batch, tm)
    tm = _round_up(_cdiv(batch, n_blocks), _SUBLANE)
    padded_batch = tm * n_blocks

    # --- wrapper-side layout / dtype prep (weights only; x stays f32) --------
    xp = x.astype(jnp.float32)
    if padded_batch != batch:
        xp = jnp.pad(xp, ((0, padded_batch - batch), (0, 0)))

    softmax_on = (w_softmax == "yes")
    w1 = params["w1"].astype(jnp.bfloat16)
    b1 = params["b1"].astype(jnp.float32)
    w2 = jnp.pad(params["w2"], ((0, 0), (0, h2_p - _H2))).astype(jnp.bfloat16)
    b2 = jnp.pad(params["b2"], ((0, 0), (0, h2_p - _H2))).astype(jnp.float32)
    w3 = jnp.pad(params["w3"],
                 ((0, h2_p - _H2), (0, n_out_p - n_out))).astype(jnp.bfloat16)
    # Bake the lane mask into b3: padded logit lanes get -1e30 when softmax is
    # enabled (exp -> 0), plain 0 otherwise (padded lanes are sliced off).
    b3 = jnp.pad(params["b3"].astype(jnp.float32),
                 ((0, 0), (0, n_out_p - n_out)),
                 constant_values=(-1e30 if softmax_on else 0.0))

    kernel = functools.partial(_mlp_kernel, w_softmax=softmax_on)
    resident = lambda a: pl.BlockSpec(a.shape, lambda i: (0,) * a.ndim)

    flops = 2 * padded_batch * (n_in * _H1 + _H1 * h2_p + h2_p * n_out_p)
    transcendentals = padded_batch * (_H1 + h2_p +
                                      (n_out_p if softmax_on else 0))
    out_bytes = padded_batch * n_out_p * jnp.dtype(out_dtype).itemsize
    bytes_accessed = (xp.size * 4 + (w1.size + w2.size + w3.size) * 2
                      + (b1.size + b2.size + b3.size) * 4 + out_bytes)

    out = pl.pallas_call(
        kernel,
        out_shape=jax.ShapeDtypeStruct((padded_batch, n_out_p), out_dtype),
        grid_spec=pltpu.PrefetchScalarGridSpec(
            num_scalar_prefetch=0,
            grid=(n_blocks,),
            in_specs=[
                pl.BlockSpec((tm, n_in), lambda i: (i, 0)),   # x row tile
                resident(w1), resident(b1),
                resident(w2), resident(b2),
                resident(w3), resident(b3),
            ],
            out_specs=pl.BlockSpec((tm, n_out_p), lambda i: (i, 0)),
        ),
        compiler_params=pltpu.CompilerParams(
            dimension_semantics=("parallel",),
            vmem_limit_bytes=32 * 1024 * 1024,
        ),
        cost_estimate=pl.CostEstimate(flops=flops,
                                      transcendentals=transcendentals,
                                      bytes_accessed=bytes_accessed),
    )(xp, w1, b1, w2, b2, w3, b3)

    if return_padded:
        return out
    return out[:batch, :n_out]


def init_params(key, n_in, n_out):
    """Deterministic synthetic parameter init (PyTorch-like uniform fan-in)."""
    ks = jax.random.split(key, 6)

    def linear(kw, kb, fan_in, fan_out):
        bound = 1.0 / jnp.sqrt(fan_in)
        w = jax.random.uniform(kw, (fan_in, fan_out), jnp.float32, -bound, bound)
        b = jax.random.uniform(kb, (1, fan_out), jnp.float32, -bound, bound)
        return w, b

    w1, b1 = linear(ks[0], ks[1], n_in, _H1)
    w2, b2 = linear(ks[2], ks[3], _H1, _H2)
    w3, b3 = linear(ks[4], ks[5], _H2, n_out)
    return {"w1": w1, "b1": b1, "w2": w2, "b2": b2, "w3": w3, "b3": b3}


def _reference(x, params, w_softmax):
    """Pure-JAX reference with the same bf16-weight quantization."""
    h1 = jnp.tanh(jnp.dot(x.astype(jnp.bfloat16), params["w1"].astype(jnp.bfloat16),
                          preferred_element_type=jnp.float32) + params["b1"])
    h2 = jnp.tanh(jnp.dot(h1.astype(jnp.bfloat16), params["w2"].astype(jnp.bfloat16),
                          preferred_element_type=jnp.float32) + params["b2"])
    logits = jnp.dot(h2.astype(jnp.bfloat16), params["w3"].astype(jnp.bfloat16),
                     preferred_element_type=jnp.float32) + params["b3"]
    if w_softmax == "yes":
        return jax.nn.softmax(logits, axis=-1)
    return logits


if __name__ == "__main__":
    key = jax.random.PRNGKey(0)
    k_x, k_p, k_x2, k_x3 = jax.random.split(key, 4)

    batch, n_in, n_out = 8, 32, 10
    x = jax.random.normal(k_x, (batch, n_in), jnp.float32)
    params = init_params(k_p, n_in, n_out)

    # softmax path
    y = jax.block_until_ready(softmax_model_forward(x, params, w_softmax="yes"))
    assert y.shape == (batch, n_out)
    assert jnp.allclose(jnp.sum(y, axis=-1), 1.0, atol=1e-3), jnp.sum(y, axis=-1)
    y_ref = _reference(x, params, "yes")
    assert jnp.allclose(y, y_ref, atol=3e-2), float(jnp.max(jnp.abs(y - y_ref)))

    # logits (no-softmax) path
    logits = jax.block_until_ready(softmax_model_forward(x, params, w_softmax="no"))
    assert logits.shape == (batch, n_out)
    logits_ref = _reference(x, params, "no")
    assert jnp.allclose(logits, logits_ref, atol=3e-2)

    # multi-tile batch grid with an awkward batch (balanced tiling -> 3 x 200)
    xb = jax.random.normal(k_x2, (600, n_in), jnp.float32)
    yb = jax.block_until_ready(
        softmax_model_forward(xb, params, w_softmax="yes", tm=256))
    assert yb.shape == (600, n_out)
    assert jnp.allclose(jnp.sum(yb, axis=-1), 1.0, atol=1e-3)

    # padded-row path (batch not a multiple of 8) + bf16 output option
    xc = jax.random.normal(k_x3, (5, n_in), jnp.float32)
    yc = jax.block_until_ready(
        softmax_model_forward(xc, params, w_softmax="yes",
                              out_dtype=jnp.bfloat16))
    assert yc.shape == (5, n_out) and yc.dtype == jnp.bfloat16
    assert jnp.allclose(jnp.sum(yc.astype(jnp.float32), axis=-1), 1.0, atol=1e-2)

    print("KERNEL_OK")
</pallas_src>

<mosaic_0001>
module attributes {stable_mosaic.version = 11 : i64} {
  func.func @_mlp_kernel(%arg0: i32, %arg1: memref<8x32xf32, #tpu.memory_space<vmem>>, %arg2: memref<32x128xbf16, #tpu.memory_space<vmem>>, %arg3: memref<1x128xf32, #tpu.memory_space<vmem>>, %arg4: memref<128x128xbf16, #tpu.memory_space<vmem>>, %arg5: memref<1x128xf32, #tpu.memory_space<vmem>>, %arg6: memref<128x128xbf16, #tpu.memory_space<vmem>>, %arg7: memref<1x128xf32, #tpu.memory_space<vmem>>, %arg8: memref<8x128xf32, #tpu.memory_space<vmem>>) attributes {dimension_semantics = [#tpu.dimension_semantics<parallel>], iteration_bounds = array<i64: 1>, scalar_prefetch = 0 : i64, scratch_operands = 0 : i64, tpu.core_type = #tpu.core_type<tc>, window_params = [{transform_indices = @transform_0, window_bounds = array<i64: 8, 32>}, {pipeline_mode = #tpu.pipeline_mode<synchronous>, transform_indices = @transform_1, window_bounds = array<i64: 32, 128>}, {pipeline_mode = #tpu.pipeline_mode<synchronous>, transform_indices = @transform_2, window_bounds = array<i64: 1, 128>}, {pipeline_mode = #tpu.pipeline_mode<synchronous>, transform_indices = @transform_3, window_bounds = array<i64: 128, 128>}, {pipeline_mode = #tpu.pipeline_mode<synchronous>, transform_indices = @transform_4, window_bounds = array<i64: 1, 128>}, {pipeline_mode = #tpu.pipeline_mode<synchronous>, transform_indices = @transform_5, window_bounds = array<i64: 128, 128>}, {pipeline_mode = #tpu.pipeline_mode<synchronous>, transform_indices = @transform_6, window_bounds = array<i64: 1, 128>}, {transform_indices = @transform_7, window_bounds = array<i64: 8, 128>}]} {
    %c0 = arith.constant 0 : index
    %c0_0 = arith.constant 0 : index
    %0 = vector.load %arg1[%c0, %c0_0] : memref<8x32xf32, #tpu.memory_space<vmem>>, vector<8x32xf32>
    %1 = arith.truncf %0 : vector<8x32xf32> to vector<8x32xbf16>
    %c0_1 = arith.constant 0 : index
    %c0_2 = arith.constant 0 : index
    %2 = vector.load %arg2[%c0_1, %c0_2] : memref<32x128xbf16, #tpu.memory_space<vmem>>, vector<32x128xbf16>
    %cst = arith.constant dense<0.000000e+00> : vector<8x128xf32>
    %3 = tpu.matmul %1, %2, %cst {dimension_numbers = #tpu.dot_dimension_numbers<[1], [0], [0], [1], [0, 0, 1, 1], [], []>} : vector<8x32xbf16>, vector<32x128xbf16>, vector<8x128xf32> -> vector<8x128xf32>
    %c0_3 = arith.constant 0 : index
    %c0_4 = arith.constant 0 : index
    %4 = vector.load %arg3[%c0_3, %c0_4] : memref<1x128xf32, #tpu.memory_space<vmem>>, vector<1x128xf32>
    %5 = vector.broadcast %4 : vector<1x128xf32> to vector<8x128xf32>
    %6 = arith.addf %3, %5 : vector<8x128xf32>
    %7 = math.tanh %6 : vector<8x128xf32>
    %8 = arith.truncf %7 : vector<8x128xf32> to vector<8x128xbf16>
    %c0_5 = arith.constant 0 : index
    %c0_6 = arith.constant 0 : index
    %9 = vector.load %arg4[%c0_5, %c0_6] : memref<128x128xbf16, #tpu.memory_space<vmem>>, vector<128x128xbf16>
    %cst_7 = arith.constant dense<0.000000e+00> : vector<8x128xf32>
    %10 = tpu.matmul %8, %9, %cst_7 {dimension_numbers = #tpu.dot_dimension_numbers<[1], [0], [0], [1], [0, 0, 1, 1], [], []>} : vector<8x128xbf16>, vector<128x128xbf16>, vector<8x128xf32> -> vector<8x128xf32>
    %c0_8 = arith.constant 0 : index
    %c0_9 = arith.constant 0 : index
    %11 = vector.load %arg5[%c0_8, %c0_9] : memref<1x128xf32, #tpu.memory_space<vmem>>, vector<1x128xf32>
    %12 = vector.broadcast %11 : vector<1x128xf32> to vector<8x128xf32>
    %13 = arith.addf %10, %12 : vector<8x128xf32>
    %14 = math.tanh %13 : vector<8x128xf32>
    %15 = arith.truncf %14 : vector<8x128xf32> to vector<8x128xbf16>
    %c0_10 = arith.constant 0 : index
    %c0_11 = arith.constant 0 : index
    %16 = vector.load %arg6[%c0_10, %c0_11] : memref<128x128xbf16, #tpu.memory_space<vmem>>, vector<128x128xbf16>
    %cst_12 = arith.constant dense<0.000000e+00> : vector<8x128xf32>
    %17 = tpu.matmul %15, %16, %cst_12 {dimension_numbers = #tpu.dot_dimension_numbers<[1], [0], [0], [1], [0, 0, 1, 1], [], []>} : vector<8x128xbf16>, vector<128x128xbf16>, vector<8x128xf32> -> vector<8x128xf32>
    %c0_13 = arith.constant 0 : index
    %c0_14 = arith.constant 0 : index
    %18 = vector.load %arg7[%c0_13, %c0_14] : memref<1x128xf32, #tpu.memory_space<vmem>>, vector<1x128xf32>
    %19 = vector.broadcast %18 : vector<1x128xf32> to vector<8x128xf32>
    %20 = arith.addf %17, %19 : vector<8x128xf32>
    %cst_15 = arith.constant dense<0xFF800000> : vector<8xf32>
    %21 = vector.multi_reduction <maximumf>, %20, %cst_15 [1] : vector<8x128xf32> to vector<8xf32>
    %22 = vector.shape_cast %21 : vector<8xf32> to vector<8x1xf32>
    %23 = vector.broadcast %22 : vector<8x1xf32> to vector<8x128xf32>
    %24 = arith.subf %20, %23 : vector<8x128xf32>
    %25 = math.exp %24 : vector<8x128xf32>
    %cst_16 = arith.constant dense<0.000000e+00> : vector<8xf32>
    %26 = vector.multi_reduction <add>, %25, %cst_16 [1] : vector<8x128xf32> to vector<8xf32>
    %27 = vector.shape_cast %26 : vector<8xf32> to vector<8x1xf32>
    %28 = vector.broadcast %27 : vector<8x1xf32> to vector<8x128xf32>
    %29 = arith.divf %25, %28 : vector<8x128xf32>
    %c0_17 = arith.constant 0 : index
    %c0_18 = arith.constant 0 : index
    %30 = vector.load %arg8[%c0_17, %c0_18] : memref<8x128xf32, #tpu.memory_space<vmem>>, vector<8x128xf32>
    tpu.vector_store %arg8[%c0_17, %c0_18], %29 {strides = array<i32>} : memref<8x128xf32, #tpu.memory_space<vmem>>, vector<8x128xf32>,
    return
  }
  func.func @transform_0(%arg0: i32) -> (i32, i32) {
    %c0_i32 = arith.constant 0 : i32
    %c0_i32_0 = arith.constant 0 : i32
    return %arg0, %c0_i32 : i32, i32
  }
  func.func @transform_1(%arg0: i32) -> (i32, i32) {
    %c0_i32 = arith.constant 0 : i32
    %c0_i32_0 = arith.constant 0 : i32
    %c0_i32_1 = arith.constant 0 : i32
    return %c0_i32, %c0_i32_0 : i32, i32
  }
  func.func @transform_2(%arg0: i32) -> (i32, i32) {
    %c0_i32 = arith.constant 0 : i32
    %c0_i32_0 = arith.constant 0 : i32
    %c0_i32_1 = arith.constant 0 : i32
    return %c0_i32, %c0_i32_0 : i32, i32
  }
  func.func @transform_3(%arg0: i32) -> (i32, i32) {
    %c0_i32 = arith.constant 0 : i32
    %c0_i32_0 = arith.constant 0 : i32
    %c0_i32_1 = arith.constant 0 : i32
    return %c0_i32, %c0_i32_0 : i32, i32
  }
  func.func @transform_4(%arg0: i32) -> (i32, i32) {
    %c0_i32 = arith.constant 0 : i32
    %c0_i32_0 = arith.constant 0 : i32
    %c0_i32_1 = arith.constant 0 : i32
    return %c0_i32, %c0_i32_0 : i32, i32
  }
  func.func @transform_5(%arg0: i32) -> (i32, i32) {
    %c0_i32 = arith.constant 0 : i32
    %c0_i32_0 = arith.constant 0 : i32
    %c0_i32_1 = arith.constant 0 : i32
    return %c0_i32, %c0_i32_0 : i32, i32
  }
  func.func @transform_6(%arg0: i32) -> (i32, i32) {
    %c0_i32 = arith.constant 0 : i32
    %c0_i32_0 = arith.constant 0 : i32
    %c0_i32_1 = arith.constant 0 : i32
    return %c0_i32, %c0_i32_0 : i32, i32
  }
  func.func @transform_7(%arg0: i32) -> (i32, i32) {
    %c0_i32 = arith.constant 0 : i32
    %c0_i32_0 = arith.constant 0 : i32
    return %arg0, %c0_i32 : i32, i32
  }
}

</mosaic_0001>

<bundles_post_ra>
// kernel: tpu_custom_call.1
= control target key start
LH: loop header
LB: loop body
LE: loop exit
PB: predicated region body
PF: predicated region fallthrough
CT: control target
= control target key end

     0   :  { %12 = vsyncpa [#allocation3], 0  ;;  %s743_s0 = inlined_call_operand.hbm [shape: f32[8,32], index: 0, kind: input, shape index: {}]   ;;  %s744_s1 = inlined_call_operand.hbm [shape: bf16[32,128], index: 1, kind: input, shape index: {}]   ;;  %s745_s2 = inlined_call_operand.vmem [shape: f32[1,128], index: 2, kind: input, shape index: {}]   ;;  %s746_s3 = inlined_call_operand.hbm [shape: bf16[128,128], index: 3, kind: input, shape index: {}]   ;;  %s747_s4 = inlined_call_operand.vmem [shape: f32[1,128], index: 4, kind: input, shape index: {}]   ;;  %s748_s5 = inlined_call_operand.hbm [shape: bf16[128,128], index: 5, kind: input, shape index: {}]   ;;  %s749_s6 = inlined_call_operand.vmem [shape: f32[1,128], index: 6, kind: input, shape index: {}]   ;;  %s750_s7 = inlined_call_operand.hbm [shape: f32[8,128], index: 7, kind: output, shape index: {}]  }
   0x1   :  { %13 = vsyncpa [#allocation6], 0 }
   0x2   :  { %14 = vsyncpa [#allocation9], 0 }
   0x3   :  { %15 = vsyncpa [#allocation4], 0  ;;  %s637_s24 = smov [#allocation5]  }
   0x4   :  { %s31_s25 = sshll.u32 %s637_s24, 4  ;;  %s32_s25 = int_to_ptr.vmem [resolvable:$true] %s31_s25 }
   0x5   :  { %s537_s26 = scalar_lea.vmem %s32_s25, 256  ;;  %p542_p1 = scmp.lt.s32.totalorder %s32_s25, %s32_s25 }
   0x6   :  { %p538_p0 = scmp.ne.s32.totalorder %s32_s25, %s537_s26  ;;  %p543_p2 = scmp.lt.s32.totalorder %s537_s26, %s537_s26 }
   0x8   :  { %p544_p3 = por %p543_p2, %p542_p1 }
   0xa   :  { %p545_p4 = pnand %p544_p3, %p538_p0 }
   0xc   :  { %548 = shalt.err (!%p545_p4)
}
   0xd   :  { %s638_s27 = smov 64   ;;  %s639_s28 = smov 4  }
   0xe   :  { %37 = dma.hbm_to_vmem [thread:$0]  %s744_s1, 256, %s32_s25, [#allocation6], %s638_s27, %s638_s27, %s639_s28  }
   0xf   :  { %s640_s8 = smov [#allocation2]   ;;  %s641_s10 = smov [#allocation7]  }
  0x10   :  { %s22_s9 = sshll.u32 %s640_s8, 4  ;;  %s45_s11 = sshll.u32 %s641_s10, 4  ;;  %s23_s9 = int_to_ptr.vmem [resolvable:$true] %s22_s9  ;;  %s46_s11 = int_to_ptr.vmem [resolvable:$true] %s45_s11 }
  0x11   :  { %s557_s12 = scalar_lea.vmem %s23_s9, 128  ;;  %p562_p6 = scmp.lt.s32.totalorder %s23_s9, %s23_s9 }
  0x12   :  { %p558_p5 = scmp.ne.s32.totalorder %s23_s9, %s557_s12  ;;  %p563_p7 = scmp.lt.s32.totalorder %s557_s12, %s557_s12 }
  0x14   :  { %p564_p8 = por %p563_p7, %p562_p6 }
  0x16   :  { %p565_p9 = pnand %p564_p8, %p558_p5 }
  0x18   :  { %568 = shalt.err (!%p565_p9)
}
  0x19   :  { %25 = dma.hbm_to_vmem [thread:$0]  %s743_s0, 128, %s23_s9, [#allocation3]  }
  0x1a   :  { %s577_s15 = scalar_lea.vmem %s46_s11, 1024  ;;  %p582_p11 = scmp.lt.s32.totalorder %s46_s11, %s46_s11 }
  0x1b   :  { %p578_p10 = scmp.ne.s32.totalorder %s46_s11, %s577_s15  ;;  %p583_p12 = scmp.lt.s32.totalorder %s577_s15, %s577_s15 }
  0x1d   :  { %p584_p13 = por %p583_p12, %p582_p11 }
  0x1f   :  { %p585_p0 = pnand %p584_p13, %p578_p10 }
  0x21   :  { %588 = shalt.err (!%p585_p0)
}
  0x22   :  { %51 = dma.hbm_to_vmem [thread:$0]  %s746_s3, 1024, %s46_s11, [#allocation6], %s638_s27, %s638_s27, %s639_s28  }
  0x23   :  { %s642_s17 = smov [#allocation8]  }
  0x24   :  { %s59_s18 = sshll.u32 %s642_s17, 4  ;;  %s60_s18 = int_to_ptr.vmem [resolvable:$true] %s59_s18 }
  0x25   :  { %s597_s19 = scalar_lea.vmem %s60_s18, 1024  ;;  %p602_p2 = scmp.lt.s32.totalorder %s60_s18, %s60_s18 }
  0x26   :  { %p598_p1 = scmp.ne.s32.totalorder %s60_s18, %s597_s19  ;;  %p603_p3 = scmp.lt.s32.totalorder %s597_s19, %s597_s19 }
  0x28   :  { %p604_p4 = por %p603_p3, %p602_p2 }
  0x2a   :  { %p605_p5 = pnand %p604_p4, %p598_p1 }
  0x2c   :  { %608 = shalt.err (!%p605_p5)
}
  0x2d   :  { %65 = dma.hbm_to_vmem [thread:$0]  %s748_s5, 1024, %s60_s18, [#allocation9], %s638_s27, %s638_s27, %s639_s28  }
  0x2e   :  { %629 = dma.done.wait [#allocation3], 128  }
  0x2f   :  { %630 = vsyncadd [#allocation3], 4294967168 }
  0x30   :  { %631 = dma.done.wait [#allocation6], 1280  }
  0x31   :  { %632 = vsyncadd [#allocation6], 4294966016 }
  0x32   :  { %633 = dma.done.wait [#allocation9], 1024  }
  0x33   :  { %634 = vsyncadd [#allocation9], 4294966272  ;;  %v643_v0 = vmov 0.0   ;;  %vm644_vm0 = vmmov 0   ;;  %v503_v1 = vld [vmem:[#allocation5 + $0x8] sm:$0xff]   ;;  %v504_v2 = vld [vmem:[#allocation5] sm:$0xff]  }
  0x34   :  { %446 = vmatprep.subr.bf16.mxu0 %v643_v0  ;;  %450 = vmatprep.mubr.msk.bf16.mxu0 %vm644_vm0, %v643_v0  ;;  %v81_v3 = vld [vmem:[#allocation2] sm:$0xff]  ;;  %v505_v4 = vld [vmem:[#allocation7 + $0x38] sm:$0xff]   ;;  %vm106_vm1 = vcmask 261120   ;;  %v506_v6 = vld [vmem:[#allocation7 + $0x30] sm:$0xff]  }
  0x35   :  { %454 = vmatprep.subr.bf16.mxu1 %v643_v0  ;;  %470 = vmatprep.mubr.msk.bf16.mxu1 %vm644_vm0, %v643_v0  ;;  %v82_v5 = vpack.c.bf16 %v81_v3, %v81_v3  ;;  %v507_v7 = vld [vmem:[#allocation7 + $0x28] sm:$0xff]   ;;  %v508_v8 = vld [vmem:[#allocation7 + $0x20] sm:$0xff]   ;;  %v509_v9 = vld [vmem:[#allocation7 + $0x18] sm:$0xff]  }
  0x36   :  { %447 = vmatpush3.bf16.msra.mxu0 %v503_v1  ;;  %455 = vmatpush3.bf16.msra.mxu1 %v505_v4  ;;  %v510_v10 = vld [vmem:[#allocation7 + $0x10] sm:$0xff]   ;;  %v511_v11 = vld [vmem:[#allocation7 + $0x8] sm:$0xff]   ;;  %v512_v12 = vld [vmem:[#allocation7] sm:$0xff]  }
  0x37   :  { %448 = vmatprep.subr.bf16.mxu0 %v643_v0  ;;  %456 = vmatprep.subr.bf16.mxu1 %v643_v0  ;;  %v513_v13 = vld [vmem:[#allocation8 + $0x38] sm:$0xff]   ;;  %v514_v14 = vld [vmem:[#allocation8 + $0x30] sm:$0xff]   ;;  %v515_v15 = vld [vmem:[#allocation8 + $0x28] sm:$0xff]  }
  0x38   :  { %v403_v16 = vld [vmem:[%s745_s2] ss:$0 sm:$0xff]  ;;  %v516_v24 = vld [vmem:[#allocation8 + $0x20] sm:$0xff]   ;;  %v517_v25 = vld [vmem:[#allocation8 + $0x18] sm:$0xff]  }
  0x39   :  { %v518_v26 = vld [vmem:[#allocation8 + $0x10] sm:$0xff]   ;;  %v519_v27 = vld [vmem:[#allocation8 + $0x8] sm:$0xff]   ;;  %v520_v28 = vld [vmem:[#allocation8] sm:$0xff]  }
  0x3a   :  { %449 = vmatpush3.bf16.msra.mxu0 %v504_v2  ;;  %457 = vmatpush3.bf16.msra.mxu1 %v506_v6  ;;  %v407_v29 = vld [vmem:[%s747_s4] ss:$0 sm:$0xff]  ;;  %s645_s4 = smov [#allocation10]  }
  0x3b   :  { %474 = vmatprep.subr.bf16.mxu0 %v643_v0  ;;  %458 = vmatprep.subr.bf16.mxu1 %v643_v0  ;;  %v416_v37 = vld [vmem:[%s749_s6] ss:$0 sm:$0xff]  ;;  %s392_s24 = sshll.u32 %s645_s4, 4  ;;  %s393_s24 = int_to_ptr.vmem [resolvable:$true] %s392_s24 }
  0x3c   :  { %s609_s6 = scalar_lea.vmem %s393_s24, 128  ;;  %p614_p7 = scmp.lt.s32.totalorder %s393_s24, %s393_s24 }
  0x3d   :  { %451 = vmatmul.mubr.msk.bf16.vlgmr.msra.gmra.mxu0 %vm106_vm1, %v82_v5  ;;  %p610_p6 = scmp.ne.s32.totalorder %s393_s24, %s609_s6  ;;  %p615_p8 = scmp.lt.s32.totalorder %s609_s6, %s609_s6 }
  0x3e   :  { %490 = vmatprep.mubr.msk.bf16.mxu0 %vm644_vm0, %v643_v0  ;;  %459 = vmatpush3.bf16.msra.mxu1 %v507_v7 }
  0x3f   :  { %460 = vmatprep.subr.bf16.mxu1 %v643_v0  ;;  %475 = vmatpush3.bf16.msra.mxu0 %v513_v13  ;;  %p616_p9 = por %p615_p8, %p614_p7 }
  0x40   :  { %476 = vmatprep.subr.bf16.mxu0 %v643_v0 }
  0x41   :  { %p617_p10 = pnand %p616_p9, %p610_p6 }
  0x42   :  { %461 = vmatpush3.bf16.msra.mxu1 %v508_v8 }
  0x43   :  { %462 = vmatprep.subr.bf16.mxu1 %v643_v0  ;;  %477 = vmatpush3.bf16.msra.mxu0 %v514_v14 }
  0x44   :  { %478 = vmatprep.subr.bf16.mxu0 %v643_v0 }
  0x46   :  { %463 = vmatpush3.bf16.msra.mxu1 %v509_v9 }
  0x47   :  { %464 = vmatprep.subr.bf16.mxu1 %v643_v0  ;;  %479 = vmatpush3.bf16.msra.mxu0 %v515_v15 }
  0x48   :  { %480 = vmatprep.subr.bf16.mxu0 %v643_v0 }
  0x4a   :  { %465 = vmatpush3.bf16.msra.mxu1 %v510_v10 }
  0x4b   :  { %466 = vmatprep.subr.bf16.mxu1 %v643_v0  ;;  %481 = vmatpush3.bf16.msra.mxu0 %v516_v24 }
  0x4c   :  { %482 = vmatprep.subr.bf16.mxu0 %v643_v0 }
  0x4e   :  { %467 = vmatpush3.bf16.msra.mxu1 %v511_v11 }
  0x4f   :  { %468 = vmatprep.subr.bf16.mxu1 %v643_v0  ;;  %483 = vmatpush3.bf16.msra.mxu0 %v517_v25 }
  0x50   :  { %484 = vmatprep.subr.bf16.mxu0 %v643_v0 }
  0x52   :  { %469 = vmatpush3.bf16.msra.mxu1 %v512_v12 }
  0x53   :  { %485 = vmatpush3.bf16.msra.mxu0 %v518_v26 }
  0x54   :  { %486 = vmatprep.subr.bf16.mxu0 %v643_v0 }
  0x57   :  { %487 = vmatpush3.bf16.msra.mxu0 %v519_v27 }
  0x58   :  { %488 = vmatprep.subr.bf16.mxu0 %v643_v0 }
  0x5b   :  { %489 = vmatpush3.bf16.msra.mxu0 %v520_v28 }
  0xfd   :  { %v144_v17 = vpop.f32.mrf.mxu0 }
  0xfe   :  { %v145_v18 = vadd.f32 %v403_v16, %v144_v17 }
  0xff   :  { %v452_v19 = vpop.f32.mrf.mxu0 }
 0x100   :  { %521 = vtanh.f32 %v145_v18 }
 0x101   :  { %v147_v20 = vpop.f32.mrf.mxu0 }
 0x103   :  { %v453_v21 = vpop.f32.mrf.mxu0 }
 0x10d   :  { %v522_v22 = vpop.eup %521 }
 0x10e   :  { %v151_v23 = vpack.c.bf16 %v522_v22, %v522_v22 }
 0x110   :  { %471 = vmatmul.mubr.bf16.vlgmr.msra.gmra.mxu1 %v151_v23 }
 0x1d0   :  { %v257_v30 = vpop.f32.mrf.mxu1 }
 0x1d1   :  { %v258_v31 = vadd.f32 %v407_v29, %v257_v30 }
 0x1d2   :  { %v472_v32 = vpop.f32.mrf.mxu1 }
 0x1d3   :  { %523 = vtanh.f32 %v258_v31 }
 0x1d4   :  { %v260_v33 = vpop.f32.mrf.mxu1 }
 0x1d6   :  { %v473_v34 = vpop.f32.mrf.mxu1 }
 0x1e0   :  { %v524_v35 = vpop.eup %523 }
 0x1e1   :  { %v264_v36 = vpack.c.bf16 %v524_v35, %v524_v35 }
 0x1e3   :  { %491 = vmatmul.mubr.bf16.vlgmr.msra.gmra.mxu0 %v264_v36 }
 0x2a3   :  { %v370_v38 = vpop.f32.mrf.mxu0 }
 0x2a4   :  { %v371_v39 = vadd.f32 %v416_v37, %v370_v38 }
 0x2a5   :  { %v492_v40 = vpop.f32.mrf.mxu0 }
 0x2a6   :  { %376 = vmax.xlane.f32.xlu0 %v371_v39 }
 0x2a7   :  { %v373_v41 = vpop.f32.mrf.mxu0 }
 0x2a9   :  { %v493_v42 = vpop.f32.mrf.mxu0 }
 0x32f   :  { %v377_v43 = vpop.xlane.xlu0 %376 }
 0x330   :  { %v378_v44 = vsub.f32 %v371_v39, %v377_v43 }
 0x332   :  { %v379_v45 = vmul.f32 1.442695, %v378_v44 }
 0x334   :  { %525 = vpow2.f32 %v379_v45 }
 0x341   :  { %v526_v46 = vpop.eup %525 }
 0x342   :  { %381 = vadd.xlane.f32.xlu0 %v526_v46 }
 0x3cb   :  { %v382_v47 = vpop.xlane.xlu0 %381 }
 0x3cc   :  { %527 = vrcp.f32 %v382_v47 }
 0x3d9   :  { %v528_v48 = vpop.eup %527 }
 0x3da   :  { %v384_v49 = vmul.f32 %v528_v48, %v526_v46 }
 0x3dc   :  { %385 = vst [vmem:[#allocation10] sm:$0xff] %v384_v49 }
 0x3dd   :  { %620 = shalt.err (!%p617_p10)
}
 0x3de   :  { %395 = dma.vmem_to_hbm [thread:$0]  %s393_s24, 128, %s750_s7, [#allocation4]  }
 0x3df   :  { %635 = dma.done.wait [#allocation4], 128  }
 0x3e0   :  { %636 = vsyncadd [#allocation4], 4294967168 }
 0x3e1   :  { %399 = vsyncpa [#allocation3], 1 }
 0x3e2   :  { %400 = vsyncpa [#allocation6], 1 }
 0x3e3   :  { %401 = vsyncpa [#allocation9], 1 }
 0x3e4   :  { %402 = vsyncpa [#allocation4], 1 }

</bundles_post_ra>
